<compile_context>
chip_gen: v5e
topology: v5e:2x2
jax: 0.10.0
libtpu: 0.0.40
codegen_flags: <defaults>
</compile_context>

<pallas_src>
import jax
import jax.numpy as jnp
from jax.experimental import pallas as pl
from jax.experimental.pallas import tpu as pltpu


def _round_up(x, m):
    return ((x + m - 1) // m) * m


def _cdiv(a, b):
    return (a + b - 1) // b


def _pick_vmem_limit():
    try:
        cap = int(pltpu.get_tpu_info().vmem_capacity_bytes)
    except Exception:
        cap = 128 * 1024 * 1024
    # <= ~48 MiB on v7x (64 MiB physical), up to 96 MiB on v5e/v6e.
    return max(32 * 1024 * 1024, min(96 * 1024 * 1024, (cap * 3) // 4))


VMEM_LIMIT = _pick_vmem_limit()


# ---------------------------------------------------------------------------
# Fused bf16 matmul + (folded BN) scale/bias + optional residual + ReLU
# ---------------------------------------------------------------------------
def _make_matmul_kernel(apply_relu, has_residual):
    def kernel(*refs):
        if has_residual:
            a_ref, b_ref, s_ref, c_ref, r_ref, o_ref, acc_ref = refs
        else:
            a_ref, b_ref, s_ref, c_ref, o_ref, acc_ref = refs

        @pl.when(pl.program_id(2) == 0)
        def _():
            acc_ref[...] = jnp.zeros_like(acc_ref)

        acc_ref[...] += jnp.dot(a_ref[...], b_ref[...],
                                preferred_element_type=jnp.float32)

        @pl.when(pl.program_id(2) == pl.num_programs(2) - 1)
        def _():
            y = acc_ref[...] * s_ref[...] + c_ref[...]
            if has_residual:
                y = y + r_ref[...]
            if apply_relu:
                y = jnp.maximum(y, 0.0)
            o_ref[...] = y.astype(o_ref.dtype)

    return kernel


def _matmul_tiles(M, K, N):
    # tm: multiple of 16 (bf16 sublane packing) or equal to the full M dim.
    if M <= 16:
        tm = M
    elif M <= 256:
        tm = _round_up(M, 16)
    else:
        tm = 256
    gm = _cdiv(M, tm)

    Np0 = _round_up(N, 128)
    tn = min(512, Np0)
    if gm == 1 and Np0 >= 256:
        # keep >= 2 blocks on a parallel axis so both v7x TensorCores get work
        tn = min(tn, max(128, (Np0 // 2 // 128) * 128))
    gn = _cdiv(N, tn)
    if gm == 1 and gn == 1 and M >= 32:
        tm = max(16, _round_up(M // 2, 16))

    # tk: largest multiple of 128 (<= 1024) that divides K rounded up to 128,
    # so the zero-padded K tail is minimal and the K grid divides exactly.
    Kp = _round_up(K, 128)
    tk = 128
    for cand in range(1024, 127, -128):
        if Kp % cand == 0:
            tk = cand
            break
    return tm, tk, tn, Kp


def matmul_affine(a, b, scale, bias, residual=None, relu=False):
    """out = [relu]((a @ b) * scale + bias [+ residual]); bf16 MXU, f32 acc."""
    M, K = a.shape
    K2, N = b.shape
    assert K == K2
    has_res = residual is not None

    tm, tk, tn, Kp = _matmul_tiles(M, K, N)

    a_p = jnp.pad(a, ((0, 0), (0, Kp - K))).astype(jnp.bfloat16)
    b_p = jnp.pad(b, ((0, Kp - K), (0, 0))).astype(jnp.bfloat16)
    s_p = scale.astype(jnp.float32).reshape(1, N)
    c_p = bias.astype(jnp.float32).reshape(1, N)

    in_specs = [
        pl.BlockSpec((tm, tk), lambda i, j, k: (i, k)),
        pl.BlockSpec((tk, tn), lambda i, j, k: (k, j)),
        pl.BlockSpec((1, tn), lambda i, j, k: (0, j)),
        pl.BlockSpec((1, tn), lambda i, j, k: (0, j)),
    ]
    args = [a_p, b_p, s_p, c_p]
    if has_res:
        in_specs.append(pl.BlockSpec((tm, tn), lambda i, j, k: (i, j)))
        args.append(residual.astype(jnp.float32))

    return pl.pallas_call(
        _make_matmul_kernel(relu, has_res),
        out_shape=jax.ShapeDtypeStruct((M, N), jnp.float32),
        grid_spec=pltpu.PrefetchScalarGridSpec(
            num_scalar_prefetch=0,
            grid=(_cdiv(M, tm), _cdiv(N, tn), Kp // tk),
            in_specs=in_specs,
            out_specs=pl.BlockSpec((tm, tn), lambda i, j, k: (i, j)),
            scratch_shapes=[pltpu.VMEM((tm, tn), jnp.float32)],
        ),
        compiler_params=pltpu.CompilerParams(
            dimension_semantics=("parallel", "parallel", "arbitrary"),
            vmem_limit_bytes=VMEM_LIMIT,
        ),
    )(*args)


# ---------------------------------------------------------------------------
# Elementwise affine (standalone BatchNorm / ReLU), (B*H*W, C) layout
# ---------------------------------------------------------------------------
def _make_affine_kernel(apply_relu):
    def kernel(x_ref, s_ref, c_ref, o_ref):
        y = x_ref[...].astype(jnp.float32) * s_ref[...] + c_ref[...]
        if apply_relu:
            y = jnp.maximum(y, 0.0)
        o_ref[...] = y.astype(o_ref.dtype)
    return kernel


def affine(x2d, scale, bias, relu=False):
    M, N = x2d.shape
    tm = M if M <= 8 else min(1024, _round_up(M, 8))
    tn = min(1024, _round_up(N, 128))
    s = scale.astype(jnp.float32).reshape(1, N)
    c = bias.astype(jnp.float32).reshape(1, N)
    return pl.pallas_call(
        _make_affine_kernel(relu),
        out_shape=jax.ShapeDtypeStruct((M, N), x2d.dtype),
        grid_spec=pltpu.PrefetchScalarGridSpec(
            num_scalar_prefetch=0,
            grid=(_cdiv(M, tm), _cdiv(N, tn)),
            in_specs=[pl.BlockSpec((tm, tn), lambda i, j: (i, j)),
                      pl.BlockSpec((1, tn), lambda i, j: (0, j)),
                      pl.BlockSpec((1, tn), lambda i, j: (0, j))],
            out_specs=pl.BlockSpec((tm, tn), lambda i, j: (i, j)),
        ),
        compiler_params=pltpu.CompilerParams(
            dimension_semantics=("parallel", "parallel"),
            vmem_limit_bytes=VMEM_LIMIT,
        ),
    )(x2d, s, c)


def affine_nhwc(x, scale, bias, relu=False):
    B, H, W, C = x.shape
    y = affine(x.reshape(B * H * W, C), scale, bias, relu=relu)
    return y.reshape(B, H, W, C)


# ---------------------------------------------------------------------------
# MaxPool 3x3 stride 2 pad 1 (NHWC): 9 shifted maxima inside one kernel
# ---------------------------------------------------------------------------
def _make_maxpool_kernel(H, W):
    def kernel(x_ref, o_ref):
        x = x_ref[0]                       # (H+2, W+2, C) padded tile
        rh = x[0:H, :, :]
        for ky in (1, 2):
            rh = jnp.maximum(rh, x[ky:ky + H, :, :])
        r = rh[:, 0:W, :]
        for kx in (1, 2):
            r = jnp.maximum(r, rh[:, kx:kx + W, :])
        o_ref[0] = r                       # stride-1 pooled; subsampled outside
    return kernel


def maxpool_3x3_s2_p1(x):  # NHWC in, NHWC out
    B, H, W, C = x.shape
    xp = jnp.pad(x, ((0, 0), (1, 1), (1, 1), (0, 0)),
                 constant_values=-jnp.inf)
    Hp, Wp = H + 2, W + 2
    out = pl.pallas_call(
        _make_maxpool_kernel(H, W),
        out_shape=jax.ShapeDtypeStruct((B, H, W, C), x.dtype),
        grid_spec=pltpu.PrefetchScalarGridSpec(
            num_scalar_prefetch=0,
            grid=(B,),
            in_specs=[pl.BlockSpec((1, Hp, Wp, C), lambda b: (b, 0, 0, 0))],
            out_specs=pl.BlockSpec((1, H, W, C), lambda b: (b, 0, 0, 0)),
        ),
        compiler_params=pltpu.CompilerParams(
            dimension_semantics=("parallel",),
            vmem_limit_bytes=VMEM_LIMIT,
        ),
    )(xp)
    return out[:, ::2, ::2, :]


# ---------------------------------------------------------------------------
# Global average pool: NHWC -> (B, C, 1, 1)
# ---------------------------------------------------------------------------
def _make_avgpool_kernel(inv):
    def kernel(x_ref, o_ref):
        s = jnp.sum(x_ref[...].astype(jnp.float32), axis=1, keepdims=True)
        o_ref[...] = (s * inv).astype(o_ref.dtype)
    return kernel


def global_avgpool(x):  # NHWC
    B, H, W, C = x.shape
    HW = H * W
    xr = x.reshape(B, HW, C)
    out = pl.pallas_call(
        _make_avgpool_kernel(1.0 / float(HW)),
        out_shape=jax.ShapeDtypeStruct((B, 1, C), x.dtype),
        grid_spec=pltpu.PrefetchScalarGridSpec(
            num_scalar_prefetch=0,
            grid=(B,),
            in_specs=[pl.BlockSpec((1, HW, C), lambda b: (b, 0, 0))],
            out_specs=pl.BlockSpec((1, 1, C), lambda b: (b, 0, 0)),
        ),
        compiler_params=pltpu.CompilerParams(
            dimension_semantics=("parallel",),
            vmem_limit_bytes=VMEM_LIMIT,
        ),
    )(xr)
    return jnp.transpose(out, (0, 2, 1)).reshape(B, C, 1, 1)


# ---------------------------------------------------------------------------
# Conv2d (no bias) lowered to im2col + fused Pallas matmul, NHWC end-to-end
# ---------------------------------------------------------------------------
def conv_bn_act(x, w, scale, bias, *, stride=1, padding=0, relu=False,
                residual=None):
    B, H, W, Cin = x.shape
    Cout, Cin2, KH, KW = w.shape
    assert Cin == Cin2
    if padding:
        x = jnp.pad(x, ((0, 0), (padding, padding), (padding, padding), (0, 0)))
    Hp, Wp = x.shape[1], x.shape[2]
    Ho = (Hp - KH) // stride + 1
    Wo = (Wp - KW) // stride + 1

    if KH == 1 and KW == 1:
        patches = x[:, ::stride, ::stride, :]
        Kdim = Cin
    else:
        # TODO(synk): a direct-window (taps-as-K-grid-axis) Pallas conv would
        # avoid this im2col materialization; at these small shapes the XLA glue
        # below is negligible so it is kept for simplicity/robustness.
        cols = [x[:, ky:ky + stride * Ho:stride, kx:kx + stride * Wo:stride, :]
                for ky in range(KH) for kx in range(KW)]
        patches = jnp.concatenate(cols, axis=-1)
        Kdim = KH * KW * Cin

    a = patches.reshape(B * Ho * Wo, Kdim)
    bmat = jnp.transpose(w, (2, 3, 1, 0)).reshape(Kdim, Cout)
    r2 = residual.reshape(B * Ho * Wo, Cout) if residual is not None else None
    out2 = matmul_affine(a, bmat, scale, bias, residual=r2, relu=relu)
    return out2.reshape(B, Ho, Wo, Cout)


# ---------------------------------------------------------------------------
# ResNet-152 forward (inference mode; BN folded into scale/bias), one jit
# ---------------------------------------------------------------------------
def bottleneck(x, p, stride):
    if "dw" in p:   # downsample branch (1x1 conv + BN), no ReLU
        identity = conv_bn_act(x, p["dw"], p["dbn"][0], p["dbn"][1],
                               stride=stride)
    else:
        identity = x
    out = conv_bn_act(x, p["w1"], p["bn1"][0], p["bn1"][1], relu=True)
    out = conv_bn_act(out, p["w2"], p["bn2"][0], p["bn2"][1],
                      stride=stride, padding=1, relu=True)
    # last conv: folded BN + residual add + ReLU fused into the matmul epilogue
    out = conv_bn_act(out, p["w3"], p["bn3"][0], p["bn3"][1],
                      relu=True, residual=identity)
    return out


def resnet_encoder_forward(x_nchw, params):
    feats = [x_nchw]
    x = jnp.transpose(x_nchw, (0, 2, 3, 1))      # NHWC internally (lane-dense C)

    def emit(t):                                  # NHWC -> NCHW only for output
        feats.append(jnp.transpose(t, (0, 3, 1, 2)))

    c1 = params["conv1_w"].shape[0]
    ones = jnp.ones((c1,), jnp.float32)
    zeros = jnp.zeros((c1,), jnp.float32)
    x = conv_bn_act(x, params["conv1_w"], ones, zeros, stride=2, padding=3)
    emit(x)                                                       # conv1
    x = affine_nhwc(x, params["bn1"][0], params["bn1"][1])
    emit(x)                                                       # bn1
    x = affine_nhwc(x, ones, zeros, relu=True)
    emit(x)                                                       # relu
    x = maxpool_3x3_s2_p1(x)
    emit(x)                                                       # maxpool
    for li, layer in enumerate(params["layers"]):                 # layer1..4
        for bi, p in enumerate(layer):
            stride = 2 if (li > 0 and bi == 0) else 1
            x = bottleneck(x, p, stride)
        emit(x)
    feats.append(global_avgpool(x))                               # avgpool
    return tuple(feats)


# ---------------------------------------------------------------------------
# Deterministic random parameters reproducing the resnet152 architecture
# ---------------------------------------------------------------------------
BLOCKS = (3, 8, 36, 3)
PLANES = (64, 128, 256, 512)
EXPANSION = 4


def _conv_init(key, cout, cin, kh, kw):
    fan_in = cin * kh * kw
    std = (2.0 / fan_in) ** 0.5
    return jax.random.normal(key, (cout, cin, kh, kw), jnp.float32) * std


def _bn_fold(key, c, gamma_scale=1.0):
    # Inference-mode BN folded to y = x*scale + bias (general fold formula,
    # with fresh running stats mean=0 / var=1).
    k1, k2 = jax.random.split(key)
    gamma = gamma_scale * (1.0 + 0.1 * jax.random.normal(k1, (c,), jnp.float32))
    beta = 0.05 * jax.random.normal(k2, (c,), jnp.float32)
    mean = jnp.zeros((c,), jnp.float32)
    var = jnp.ones((c,), jnp.float32)
    eps = 1e-5
    scale = gamma / jnp.sqrt(var + eps)
    bias = beta - mean * scale
    return scale, bias


def build_resnet152_params(key):
    keys = iter(jax.random.split(key, 2048))
    nk = lambda: next(keys)
    params = {"conv1_w": _conv_init(nk(), 64, 3, 7, 7), "bn1": _bn_fold(nk(), 64)}
    layers = []
    in_c = 64
    for li, (nblocks, planes) in enumerate(zip(BLOCKS, PLANES)):
        blocks = []
        for bi in range(nblocks):
            out_c = planes * EXPANSION
            p = {
                "w1": _conv_init(nk(), planes, in_c, 1, 1),
                "bn1": _bn_fold(nk(), planes),
                "w2": _conv_init(nk(), planes, planes, 3, 3),
                "bn2": _bn_fold(nk(), planes),
                "w3": _conv_init(nk(), out_c, planes, 1, 1),
                # small gamma on the block-output BN keeps the 50-block
                # residual stream numerically tame with random weights
                "bn3": _bn_fold(nk(), out_c, gamma_scale=0.2),
            }
            if bi == 0:   # stride != 1 or channel change -> downsample branch
                p["dw"] = _conv_init(nk(), out_c, in_c, 1, 1)
                p["dbn"] = _bn_fold(nk(), out_c)
            blocks.append(p)
            in_c = out_c
        layers.append(blocks)
    params["layers"] = layers
    return params


# ---------------------------------------------------------------------------
if __name__ == "__main__":
    key = jax.random.PRNGKey(0)
    k_in, k_par, k_chk = jax.random.split(key, 3)

    x = jax.random.normal(k_in, (2, 3, 32, 32), jnp.float32)
    params = build_resnet152_params(k_par)

    # Sanity check: fused bf16 matmul+BN+residual+ReLU kernel vs JAX reference
    a = jax.random.normal(jax.random.fold_in(k_chk, 0), (37, 200), jnp.float32)
    b = jax.random.normal(jax.random.fold_in(k_chk, 1), (200, 96), jnp.float32)
    s = jax.random.normal(jax.random.fold_in(k_chk, 2), (96,), jnp.float32)
    c = jax.random.normal(jax.random.fold_in(k_chk, 3), (96,), jnp.float32)
    r = jax.random.normal(jax.random.fold_in(k_chk, 4), (37, 96), jnp.float32)
    got = matmul_affine(a, b, s, c, residual=r, relu=True)
    a16 = a.astype(jnp.bfloat16).astype(jnp.float32)
    b16 = b.astype(jnp.bfloat16).astype(jnp.float32)
    ref = jnp.maximum(
        jnp.dot(a16, b16, precision=jax.lax.Precision.HIGHEST) * s[None, :]
        + c[None, :] + r, 0.0)
    assert bool(jnp.allclose(got, ref, atol=2e-2, rtol=2e-2)), \
        "matmul kernel mismatch"

    forward = jax.jit(resnet_encoder_forward)
    feats = jax.block_until_ready(forward(x, params))

    expected_shapes = [
        (2, 3, 32, 32),      # input
        (2, 64, 16, 16),     # conv1
        (2, 64, 16, 16),     # bn1
        (2, 64, 16, 16),     # relu
        (2, 64, 8, 8),       # maxpool
        (2, 256, 8, 8),      # layer1
        (2, 512, 4, 4),      # layer2
        (2, 1024, 2, 2),     # layer3
        (2, 2048, 1, 1),     # layer4
        (2, 2048, 1, 1),     # avgpool
    ]
    assert [tuple(f.shape) for f in feats] == expected_shapes, \
        [tuple(f.shape) for f in feats]
    assert all(bool(jnp.all(jnp.isfinite(f))) for f in feats)

    print("KERNEL_OK")
</pallas_src>

<mosaic_0001>
module attributes {stable_mosaic.version = 11 : i64} {
  func.func @kernel(%arg0: i32, %arg1: i32, %arg2: i32, %arg3: memref<32x256xbf16, #tpu.memory_space<vmem>>, %arg4: memref<256x128xbf16, #tpu.memory_space<vmem>>, %arg5: memref<1x128xf32, #tpu.memory_space<vmem>>, %arg6: memref<1x128xf32, #tpu.memory_space<vmem>>, %arg7: memref<32x128xf32, #tpu.memory_space<vmem>>, %arg8: memref<32x128xf32, #tpu.memory_space<vmem>>, %arg9: memref<32x128xf32, #tpu.memory_space<vmem>>) attributes {dimension_semantics = [#tpu.dimension_semantics<parallel>, #tpu.dimension_semantics<parallel>, #tpu.dimension_semantics<arbitrary>], iteration_bounds = array<i64: 2, 1, 1>, scalar_prefetch = 0 : i64, scratch_operands = 1 : i64, tpu.core_type = #tpu.core_type<tc>, window_params = [{transform_indices = @transform_0, window_bounds = array<i64: 32, 256>}, {transform_indices = @transform_1, window_bounds = array<i64: 256, 128>}, {transform_indices = @transform_2, window_bounds = array<i64: 1, 128>}, {transform_indices = @transform_3, window_bounds = array<i64: 1, 128>}, {transform_indices = @transform_4, window_bounds = array<i64: 32, 128>}, {transform_indices = @transform_5, window_bounds = array<i64: 32, 128>}]} {
    %c0_i32 = arith.constant 0 : i32
    %0 = arith.cmpi eq, %arg2, %c0_i32 : i32
    %1 = arith.extui %0 : i1 to i32
    %c0_i32_0 = arith.constant 0 : i32
    %2 = arith.cmpi ne, %1, %c0_i32_0 : i32
    scf.if %2 {
      %cst_10 = arith.constant 0.000000e+00 : f32
      %12 = vector.broadcast %cst_10 : f32 to vector<32x128xf32>
      %c0_11 = arith.constant 0 : index
      %c0_12 = arith.constant 0 : index
      %13 = vector.load %arg9[%c0_11, %c0_12] : memref<32x128xf32, #tpu.memory_space<vmem>>, vector<32x128xf32>
      tpu.vector_store %arg9[%c0_11, %c0_12], %12 {strides = array<i32>} : memref<32x128xf32, #tpu.memory_space<vmem>>, vector<32x128xf32>,
    } else {
    }
    %c0 = arith.constant 0 : index
    %c0_1 = arith.constant 0 : index
    %3 = vector.load %arg9[%c0, %c0_1] : memref<32x128xf32, #tpu.memory_space<vmem>>, vector<32x128xf32>
    %c0_2 = arith.constant 0 : index
    %c0_3 = arith.constant 0 : index
    %4 = vector.load %arg3[%c0_2, %c0_3] : memref<32x256xbf16, #tpu.memory_space<vmem>>, vector<32x256xbf16>
    %c0_4 = arith.constant 0 : index
    %c0_5 = arith.constant 0 : index
    %5 = vector.load %arg4[%c0_4, %c0_5] : memref<256x128xbf16, #tpu.memory_space<vmem>>, vector<256x128xbf16>
    %cst = arith.constant dense<0.000000e+00> : vector<32x128xf32>
    %6 = tpu.matmul %4, %5, %cst {dimension_numbers = #tpu.dot_dimension_numbers<[1], [0], [0], [1], [0, 0, 1, 1], [], []>} : vector<32x256xbf16>, vector<256x128xbf16>, vector<32x128xf32> -> vector<32x128xf32>
    %7 = arith.addf %3, %6 : vector<32x128xf32>
    %c0_6 = arith.constant 0 : index
    %c0_7 = arith.constant 0 : index
    %8 = vector.load %arg9[%c0_6, %c0_7] : memref<32x128xf32, #tpu.memory_space<vmem>>, vector<32x128xf32>
    tpu.vector_store %arg9[%c0_6, %c0_7], %7 {strides = array<i32>} : memref<32x128xf32, #tpu.memory_space<vmem>>, vector<32x128xf32>,
    %c0_i32_8 = arith.constant 0 : i32
    %9 = arith.cmpi eq, %arg2, %c0_i32_8 : i32
    %10 = arith.extui %9 : i1 to i32
    %c0_i32_9 = arith.constant 0 : i32
    %11 = arith.cmpi ne, %10, %c0_i32_9 : i32
    scf.if %11 {
      %c0_10 = arith.constant 0 : index
      %c0_11 = arith.constant 0 : index
      %12 = vector.load %arg9[%c0_10, %c0_11] : memref<32x128xf32, #tpu.memory_space<vmem>>, vector<32x128xf32>
      %c0_12 = arith.constant 0 : index
      %c0_13 = arith.constant 0 : index
      %13 = vector.load %arg5[%c0_12, %c0_13] : memref<1x128xf32, #tpu.memory_space<vmem>>, vector<1x128xf32>
      %14 = vector.broadcast %13 : vector<1x128xf32> to vector<32x128xf32>
      %15 = arith.mulf %12, %14 : vector<32x128xf32>
      %c0_14 = arith.constant 0 : index
      %c0_15 = arith.constant 0 : index
      %16 = vector.load %arg6[%c0_14, %c0_15] : memref<1x128xf32, #tpu.memory_space<vmem>>, vector<1x128xf32>
      %17 = vector.broadcast %16 : vector<1x128xf32> to vector<32x128xf32>
      %18 = arith.addf %15, %17 : vector<32x128xf32>
      %c0_16 = arith.constant 0 : index
      %c0_17 = arith.constant 0 : index
      %19 = vector.load %arg7[%c0_16, %c0_17] : memref<32x128xf32, #tpu.memory_space<vmem>>, vector<32x128xf32>
      %20 = arith.addf %18, %19 : vector<32x128xf32>
      %cst_18 = arith.constant 0.000000e+00 : f32
      %21 = vector.broadcast %cst_18 : f32 to vector<32x128xf32>
      %22 = arith.maximumf %20, %21 : vector<32x128xf32>
      %c0_19 = arith.constant 0 : index
      %c0_20 = arith.constant 0 : index
      %23 = vector.load %arg8[%c0_19, %c0_20] : memref<32x128xf32, #tpu.memory_space<vmem>>, vector<32x128xf32>
      tpu.vector_store %arg8[%c0_19, %c0_20], %22 {strides = array<i32>} : memref<32x128xf32, #tpu.memory_space<vmem>>, vector<32x128xf32>,
    } else {
    }
    return
  }
  func.func @transform_0(%arg0: i32, %arg1: i32, %arg2: i32) -> (i32, i32) {
    %c0_i32 = arith.constant 0 : i32
    return %arg0, %arg2 : i32, i32
  }
  func.func @transform_1(%arg0: i32, %arg1: i32, %arg2: i32) -> (i32, i32) {
    %c0_i32 = arith.constant 0 : i32
    return %arg2, %arg1 : i32, i32
  }
  func.func @transform_2(%arg0: i32, %arg1: i32, %arg2: i32) -> (i32, i32) {
    %c0_i32 = arith.constant 0 : i32
    %c0_i32_0 = arith.constant 0 : i32
    return %c0_i32, %arg1 : i32, i32
  }
  func.func @transform_3(%arg0: i32, %arg1: i32, %arg2: i32) -> (i32, i32) {
    %c0_i32 = arith.constant 0 : i32
    %c0_i32_0 = arith.constant 0 : i32
    return %c0_i32, %arg1 : i32, i32
  }
  func.func @transform_4(%arg0: i32, %arg1: i32, %arg2: i32) -> (i32, i32) {
    %c0_i32 = arith.constant 0 : i32
    return %arg0, %arg1 : i32, i32
  }
  func.func @transform_5(%arg0: i32, %arg1: i32, %arg2: i32) -> (i32, i32) {
    %c0_i32 = arith.constant 0 : i32
    return %arg0, %arg1 : i32, i32
  }
}

</mosaic_0001>

<bundles_post_ra>
// kernel: tpu_custom_call.1
= control target key start
LH: loop header
LB: loop body
LE: loop exit
PB: predicated region body
PF: predicated region fallthrough
CT: control target
= control target key end

     0   :  { %10 = vsyncpa [#allocation4], 0  ;;  %s1353_s0 = inlined_call_operand.vmem [shape: bf16[37,256], index: 0, kind: input, shape index: {}]   ;;  %s1354_s1 = inlined_call_operand.vmem [shape: bf16[256,96], index: 1, kind: input, shape index: {}]   ;;  %s1355_s2 = inlined_call_operand.vmem [shape: f32[1,96], index: 2, kind: input, shape index: {}]   ;;  %s1356_s3 = inlined_call_operand.vmem [shape: f32[1,96], index: 3, kind: input, shape index: {}]   ;;  %s1357_s4 = inlined_call_operand.vmem [shape: f32[37,96], index: 4, kind: input, shape index: {}]   ;;  %s1358_s5 = inlined_call_operand.hbm [shape: f32[37,96], index: 5, kind: output, shape index: {}]  }
   0x1   :  { %12 = vsyncpa [#allocation4 + $0x1], 0  ;;  %s1143_s18 = smov 0   ;;  %s1145_s19 = smov 0  }
   0x2   :  { %s1147_s20 = smov 0   ;;  %s1149_s21 = smov 0  }
   0x3   :  { %s1151_s22 = smov 0   ;;  %s1153_s23 = smov 0  }
   0x4 LB: > { %s820_s24 = sadd.s32 4294967295, %s1108_s23   ;;  %s821_s25 = sadd.s32 4294967294, %s1108_s23   ;;  %s1108_s23 = sphi %s1153_s23, %s18_s23   ;;  %s1104_s22 = sphi %s1151_s22, %s1366_s22   ;;  %s1100_s21 = sphi %s1149_s21, %s1365_s21   ;;  %s1096_s20 = sphi %s1147_s20, %s1364_s20   ;;  %s1092_s19 = sphi %s1145_s19, %s1363_s19   ;;  %s1088_s18 = sphi %s1143_s18, %s1362_s18  }
   0x5   : > { %s37_s26 = sadd.s32 1, %s1104_s22  ;;  %s182_s27 = sadd.s32 1, %s1096_s20 }
   0x6   : > { %p39_p0 = scmp.ge.s32.totalorder %s37_s26, 2  ;;  %p192_p1 = scmp.ne.s32.totalorder %s1096_s20, %s1092_s19 }
   0x7   : > { %p193_p2 = scmp.eq.s32.totalorder %s820_s24, 1  ;;  %p198_p3 = scmp.ne.s32.totalorder %s1092_s19, %s1088_s18 }
   0x8   : > { %s1368_s26 = smov (%p39_p0, %s37_s26), 0  ;;  %p199_p5 = scmp.eq.s32.totalorder %s821_s25, 1 }
   0x9   : > { %p1183_p4 = por %p193_p2, %p192_p1  ;;  %s177_s29 = ssub.s32 %s1104_s22, %s1368_s26 }
   0xa   : > { %p827_p6 = scmp.ge.s32.totalorder %s1108_s23, 1  ;;  %p180_p7 = scmp.eq.s32.totalorder %s177_s29, 0 }
   0xb   : > { %p1190_p8 = por %p199_p5, %p198_p3  ;;  %p286_p9 = scmp.lt.s32.totalorder %s1108_s23, 3 }
   0xc   : > { %s1196_s6 = scalar_select %p180_p7, %s1096_s20, %s182_s27  }
   0xd   : > { %p287_p10 = pnand %p827_p6, %p286_p9 }
   0xe   : > { %s1217_s25 = sshll.u32 (!%p287_p10), %s1100_s21, 2  ;;  %s347_s17 = sand.u32 (!%p287_p10), 1, %s1092_s19  }
   0xf   : > { %290 = sbr.rel (%p287_p10) target bundleno = 235 (0xeb), region = 40  ;;  %p357_p11 = scmp.lt.s32.totalorder (!%p287_p10), %s1217_s25, 4 }
  0x10   : > { %s828_s12 = sshll.u32 (!%p287_p10), %s347_s17, 5 }
  0x14   : > { %v935_v0 = vld [vmem:[%s1354_s1 + $0x38] sm:$0xff]  ;;  %v934_v2 = vld [vmem:[%s1354_s1 + $0x30] sm:$0xff]  ;;  %v933_v4 = vld [vmem:[%s1354_s1 + $0x28] sm:$0xff]  ;;  %s1233_s13 = scalar_select %p357_p11, %s1217_s25, 4 }
  0x15   : > { %v943_v1 = vld [vmem:[%s1354_s1 + $0x78] sm:$0xff]  ;;  %573 = vmatpush.bf16.msra.mxu0 %v935_v0  ;;  %945 = vmatpush.bf16.msra.mxu2 %v935_v0  ;;  %v942_v3 = vld [vmem:[%s1354_s1 + $0x70] sm:$0xff]  ;;  %v941_v5 = vld [vmem:[%s1354_s1 + $0x68] sm:$0xff]  ;;  %s667_s14 = ssub.s32 (%p1183_p4), 5, %s1217_s25 }
  0x16   : > { %592 = vmatpush.bf16.msra.mxu1 %v943_v1  ;;  %953 = vmatpush.bf16.msra.mxu3 %v943_v1  ;;  %v932_v6 = vld [vmem:[%s1354_s1 + $0x20] sm:$0xff]  ;;  %v931_v8 = vld [vmem:[%s1354_s1 + $0x18] sm:$0xff]  ;;  %v930_v10 = vld [vmem:[%s1354_s1 + $0x10] sm:$0xff]  ;;  %s923_s24 = sshll.u32 %s1233_s13, 3  ;;  %s1277_s13 = scalar_lea.vmem [#allocation3], %s828_s12 }
  0x17   : > { %v940_v7 = vld [vmem:[%s1354_s1 + $0x60] sm:$0xff]  ;;  %v939_v9 = vld [vmem:[%s1354_s1 + $0x58] sm:$0xff]  ;;  %v938_v11 = vld [vmem:[%s1354_s1 + $0x50] sm:$0xff]  ;;  %s364_s9 = scalar_lea.vmem %s1353_s0, %s923_s24  ;;  %p668_p12 = scmp.lt.s32.totalorder (%p1183_p4), %s667_s14, 4 }
  0x18   : > { %v929_v12 = vld [vmem:[%s1354_s1 + $0x8] sm:$0xff]  ;;  %v928_v14 = vld [vmem:[%s1354_s1] sm:$0xff]  ;;  %v844_v18 = vld [vmem:[%s364_s9 + $0x10] sm:$0xf] }
  0x19   : > { %574 = vmatpush.bf16.msra.mxu0 %v934_v2  ;;  %946 = vmatpush.bf16.msra.mxu2 %v934_v2  ;;  %v937_v13 = vld [vmem:[%s1354_s1 + $0x48] sm:$0xff]  ;;  %v936_v15 = vld [vmem:[%s1354_s1 + $0x40] sm:$0xff]  ;;  %v927_v19 = vld [vmem:[%s364_s9 + $0x14] sm:$0xf0] }
  0x1a   : > { %593 = vmatpush.bf16.msra.mxu1 %v942_v3  ;;  %954 = vmatpush.bf16.msra.mxu3 %v942_v3  ;;  %v836_v16 = vld [vmem:[%s364_s9] sm:$0xf]  ;;  %v925_v17 = vld [vmem:[%s364_s9 + $0x4] sm:$0xf0]  ;;  %v924_v20 = vld [vmem:[%s364_s9 + $0x4] sm:$0xf]  ;;  %v845_v25 = vor.u32 %v927_v19, %v844_v18 }
  0x1b   : > { %v838_v21 = vld [vmem:[%s364_s9 + $0x8] sm:$0xf0]  ;;  %v926_v22 = vld [vmem:[%s364_s9 + $0x14] sm:$0xf]  ;;  %v846_v23 = vld [vmem:[%s364_s9 + $0x18] sm:$0xf0]  ;;  %v837_v24 = vor.u32 %v925_v17, %v836_v16  ;;  %s1268_s9 = scalar_lea.vmem %s1357_s4, %s923_s24 }
  0x1c   : > { %v841_v26 = vor.u32 %v924_v20, %v838_v21  ;;  %v849_v27 = vor.u32 %v926_v22, %v846_v23  ;;  %v1017_v29 = vld [vmem:[%s1355_s2] ss:$0 sm:$0xff]  ;;  %v644_v45 = vld [vmem:[%s1268_s9 + $0x10] sm:$0xff]  ;;  %v643_v48 = vld [vmem:[%s1268_s9 + $0x8] sm:$0xff]  ;;  %s1287_s24 = scalar_lea.sflag [#allocation4], %s347_s17 }
  0x1d   : > { %575 = vmatpush.bf16.msra.mxu0 %v933_v4  ;;  %947 = vmatpush.bf16.msra.mxu2 %v933_v4  ;;  %v1018_v32 = vld [vmem:[%s1356_s3] ss:$0 sm:$0xff]  ;;  %v645_v58 = vld [vmem:[%s1268_s9 + $0x18] sm:$0xff] }
  0x1e   : > { %594 = vmatpush.bf16.msra.mxu1 %v941_v5  ;;  %955 = vmatpush.bf16.msra.mxu3 %v941_v5  ;;  %v642_v34 = vld [vmem:[%s1268_s9] sm:$0xff] }
  0x21   : > { %576 = vmatpush.bf16.msra.mxu0 %v932_v6  ;;  %948 = vmatpush.bf16.msra.mxu2 %v932_v6 }
  0x22   : > { %595 = vmatpush.bf16.msra.mxu1 %v940_v7  ;;  %956 = vmatpush.bf16.msra.mxu3 %v940_v7 }
  0x25   : > { %577 = vmatpush.bf16.msra.mxu0 %v931_v8  ;;  %949 = vmatpush.bf16.msra.mxu2 %v931_v8 }
  0x26   : > { %596 = vmatpush.bf16.msra.mxu1 %v939_v9  ;;  %957 = vmatpush.bf16.msra.mxu3 %v939_v9 }
  0x29   : > { %578 = vmatpush.bf16.msra.mxu0 %v930_v10  ;;  %950 = vmatpush.bf16.msra.mxu2 %v930_v10 }
  0x2a   : > { %597 = vmatpush.bf16.msra.mxu1 %v938_v11  ;;  %958 = vmatpush.bf16.msra.mxu3 %v938_v11 }
  0x2d   : > { %579 = vmatpush.bf16.msra.mxu0 %v929_v12  ;;  %951 = vmatpush.bf16.msra.mxu2 %v929_v12 }
  0x2e   : > { %598 = vmatpush.bf16.msra.mxu1 %v937_v13  ;;  %959 = vmatpush.bf16.msra.mxu3 %v937_v13 }
  0x31   : > { %580 = vmatpush.bf16.msra.mxu0 %v928_v14  ;;  %952 = vmatpush.bf16.msra.mxu2 %v928_v14 }
  0x32   : > { %599 = vmatpush.bf16.msra.mxu1 %v936_v15  ;;  %960 = vmatpush.bf16.msra.mxu3 %v936_v15 }
  0x34   : > { %581 = vmatmul.bf16.vlgmr.msra.gmra.mxu0 %v837_v24  ;;  %586 = vmatmul.bf16.vlgmr.msra.gmra.mxu2 %v845_v25 }
  0x35   : > { %600 = vmatmul.bf16.vlgmr.msra.gmra.mxu1 %v841_v26  ;;  %605 = vmatmul.bf16.vlgmr.msra.gmra.mxu3 %v849_v27 }
  0xb1   : > { %v582_v28 = vpop.f32.mrf.mxu0 }
  0xb2   : > { %v601_v30 = vpop.f32.mrf.mxu1 }
  0xb3   : > { %v602_v31 = vadd.f32 %v601_v30, %v582_v28 }
  0xb5   : > { %v630_v33 = vmul.f32 %v1017_v29, %v602_v31 }
  0xb7   : > { %v638_v35 = vadd.f32 %v1018_v32, %v630_v33  ;;  %v587_v36 = vpop.f32.mrf.mxu2 }
  0xb8   : > { %v606_v37 = vpop.f32.mrf.mxu3 }
  0xb9   : > { %v646_v38 = vadd.f32 %v642_v34, %v638_v35  ;;  %v607_v39 = vadd.f32 %v606_v37, %v587_v36  ;;  %v584_v40 = vpop.f32.mrf.mxu0 }
  0xba   : > { %v603_v41 = vpop.f32.mrf.mxu1 }
  0xbb   : > { %v650_v42 = vmax.f32 %v646_v38, 0.0  ;;  %v632_v43 = vmul.f32 %v1017_v29, %v607_v39  ;;  %v604_v44 = vadd.f32 %v603_v41, %v584_v40 }
  0xbd   : > { %654 = vst [vmem:[%s1277_s13] sm:$0xff] %v650_v42  ;;  %v640_v46 = vadd.f32 %v1018_v32, %v632_v43  ;;  %v631_v47 = vmul.f32 %v1017_v29, %v604_v44 }
  0xbf   : > { %v648_v49 = vadd.f32 %v644_v45, %v640_v46  ;;  %v639_v50 = vadd.f32 %v1018_v32, %v631_v47  ;;  %v589_v51 = vpop.f32.mrf.mxu2 }
  0xc0   : > { %v608_v52 = vpop.f32.mrf.mxu3 }
  0xc1   : > { %v652_v53 = vmax.f32 %v648_v49, 0.0  ;;  %v647_v54 = vadd.f32 %v643_v48, %v639_v50  ;;  %v609_v55 = vadd.f32 %v608_v52, %v589_v51 }
  0xc3   : > { %656 = vst [vmem:[%s1277_s13 + $0x10] sm:$0xff] %v652_v53  ;;  %v651_v56 = vmax.f32 %v647_v54, 0.0  ;;  %v633_v57 = vmul.f32 %v1017_v29, %v609_v55 }
  0xc5   : > { %655 = vst [vmem:[%s1277_s13 + $0x8] sm:$0xff] %v651_v56  ;;  %v641_v59 = vadd.f32 %v1018_v32, %v633_v57 }
  0xc7   : > { %v649_v60 = vadd.f32 %v645_v58, %v641_v59  ;;  %665 = sbr.rel (!%p1183_p4) target bundleno = 235 (0xeb), region = 52 }
  0xc9   : > { %v653_v61 = vmax.f32 %v649_v60, 0.0 }
  0xcb   : > { %657 = vst [vmem:[%s1277_s13 + $0x18] sm:$0xff] %v653_v61 }
  0xcc   : > { %s1370_s14 = smov (!%p668_p12, %s667_s14), 4 }
  0xcd   : > { %s916_s15 = sshll.u32 %s1370_s14, 3 }
  0xce   : > { %s671_s16 = ssub.s32 32, %s916_s15 }
  0xcf   : > { %s672_s27 = sshll.u32 %s671_s16, 4 }
  0xd0   : > { %673 = vsyncadd %s1287_s24, %s672_s27  ;;  %p1296_p13 = scmp.ne.s32.totalorder %s916_s15, 0  ;;  %s944_s28 = sshll.u32 %s1100_s21, 5 }
  0xd1   : > { %s677_s7 = scalar_lea.hbm %s1358_s5, %s944_s28  ;;  %s679_s8 = sshll.u32 %s1277_s13, 4  ;;  %s1305_s8 = int_to_ptr.vmem [resolvable:$true] %s679_s8 }
  0xd2   : > { %s681_s9 = sshll.u32 %s677_s7, 4  ;;  %s920_s10 = sshll.u32 %s1370_s14, 7  ;;  %s1307_s9 = int_to_ptr.hbm [resolvable:$true] %s681_s9 }
  0xd3   : > { %s1019_s11 = sshra.s32 %s1305_s8, 4  ;;  %s1021_s12 = sshrl.u32 %s920_s10, 4  ;;  %s1020_s11 = int_to_ptr.vmem [resolvable:$true] %s1019_s11 }
  0xd4   : > { %s1026_s15 = scalar_lea.vmem %s1020_s11, %s1021_s12  ;;  %s1110_s21 = smov [#allocation3]  }
  0xd5   : > { %p1027_p0 = scmp.ne.s32.totalorder %s1020_s11, %s1026_s15  ;;  %s1030_s16 = scalar_lea.vmem %s1110_s21, 64 }
  0xd6   : > { %p1032_p3 = scmp.lt.s32.totalorder %s1030_s16, %s1026_s15 }
  0xd7   : > { %p1028_p1 = pnand %p1027_p0, %p1296_p13 }
  0xd9   : > { %p1029_p2 = pneg %p1028_p1 }
  0xdb   : > { %p1034_p4 = pnand %p1032_p3, %p1029_p2 }
  0xdd   : > { %1037 = shalt.err (!%p1034_p4)
}
  0xde   : > { %s1038_s13 = sshra.s32 %s1307_s9, 4  ;;  %s1049_s25 = scalar_lea.hbm %s1358_s5, 40  ;;  %s1039_s13 = int_to_ptr.hbm [resolvable:$true] %s1038_s13 }
  0xdf   : > { %s1045_s27 = scalar_lea.hbm %s1039_s13, %s1021_s12  ;;  %p1050_p9 = scmp.lt.s32.totalorder %s1039_s13, %s1358_s5 }
  0xe0   : > { %p1046_p5 = scmp.ne.s32.totalorder %s1039_s13, %s1045_s27  ;;  %p1051_p10 = scmp.lt.s32.totalorder %s1049_s25, %s1045_s27 }
  0xe2   : > { %p1047_p6 = pnand %p1046_p5, %p1296_p13  ;;  %p1052_p11 = por %p1051_p10, %p1050_p9 }
  0xe4   : > { %p1048_p7 = pneg %p1047_p6 }
  0xe6   : > { %p1053_p12 = pnand %p1052_p11, %p1048_p7 }
  0xe8   : > { %1056 = shalt.err (!%p1053_p12)
}
  0xe9   : > { %s1111_s15 = smov 128   ;;  %s1112_s12 = smov 8  }
  0xea   : > { %687 = dma.vmem_to_hbm [thread:$0]  (%p1296_p13), %s1305_s8, %s920_s10, %s1307_s9, %s1287_s24, %s1111_s15, %s1111_s15, %s1112_s12  }
  0xeb PF: > { %p966_p0 = scmp.ge.s32.totalorder %s1108_s23, 2  ;;  %s696_s21 = sand.u32 1, %s1088_s18  }
  0xec   : > { %s697_s16 = scalar_lea.sflag [#allocation4], %s696_s21 }
  0xed   : > { %p963_p1 = pnand %p966_p0, %p1190_p8 }
  0xef   : > { %p964_p2 = pneg %p963_p1 }
  0xf1   : > { %1083 = dma.done.wait (%p964_p2), %s697_s16, 512  }
  0xf2   : > { %1085 = vsyncadd (%p964_p2), %s697_s16, 4294966784  ;;  %s18_s23 = sadd.s32 1, %s1108_s23   ;;  %s1362_s18 = smov %s1092_s19 }
  0xf3   : > { %p15_p3 = scmp.ge.s32.totalorder %s18_s23, 4   ;;  %s1363_s19 = smov %s1096_s20 }
  0xf4   : > { %s1364_s20 = smov %s1196_s6  ;;  %s1365_s21 = smov %s1104_s22 }
  0xf5   : > { %s1366_s22 = smov %s1368_s26  ;;  %17 = sbr.rel (!%p15_p3) target bundleno = 4 (0x4), region = 95 }
  0xfa   :  { %703 = vsyncpa [#allocation4], 1 }
  0xfb   :  { %705 = vsyncpa [#allocation4 + $0x1], 1 }

</bundles_post_ra>
